<compile_context>
chip_gen: v6e
topology: v6e:2x2x1
jax: 0.10.0
libtpu: 0.0.40
codegen_flags: <defaults>
</compile_context>

<pallas_src>
import functools

import jax
import jax.numpy as jnp
from jax.experimental import pallas as pl
from jax.experimental.pallas import tpu as pltpu


def lstm_regressor_kernel(x_ref, wih_ref, b_ref, whh_ref, wout_ref, bout_ref,
                          out_ref, *, seq_len, batch):
    """Fused LSTM forward: input projection + recurrence + both linear heads.

    x_ref    : (T*B, D)  time-major flattened input (row = t*B + b), f32
    wih_ref  : (D, 4H)   input->gates weights (pre-transposed), f32
    b_ref    : (1, 4H)   b_ih + b_hh, f32
    whh_ref  : (H, 4H)   hidden->gates weights (pre-transposed), bf16
    wout_ref : (H, 2)    [w_sbp | w_dbp] (pre-transposed), f32
    bout_ref : (1, 2)    [b_sbp, b_dbp], f32
    out_ref  : (B, 2)    [sbp | dbp], f32
    Gate order is PyTorch-native [i, f, g, o].
    """
    T, B = seq_len, batch
    H = whh_ref.shape[0]

    # Input projection for ALL timesteps at once: one MXU matmul, off the
    # serial critical path (replaces the previous wrapper-side XLA matmul).
    preact = jnp.dot(x_ref[...], wih_ref[...],
                     preferred_element_type=jnp.float32) + b_ref[...]  # (T*B, 4H)

    whh = whh_ref[...]  # bf16, loaded once and reused every step

    h = jnp.zeros((B, H), jnp.float32)
    c = jnp.zeros((B, H), jnp.float32)

    # T is a small compile-time constant -> full static unroll.
    for t in range(T):
        # Only the recurrent matmul sits on the serial dependency chain;
        # bf16 operands avoid the multi-pass f32 MXU decomposition.
        gates = preact[t * B:(t + 1) * B, :] + jnp.dot(
            h.astype(jnp.bfloat16), whh, preferred_element_type=jnp.float32)
        # Full-width transcendentals (EUP slack); slice the 64-lane gate
        # chunks afterwards instead of splitting EUP ops mid-vreg.
        sig = jax.nn.sigmoid(gates)          # (B, 4H)
        tnh = jnp.tanh(gates)                # (B, 4H)
        i_g = sig[:, 0 * H:1 * H]
        f_g = sig[:, 1 * H:2 * H]
        g_g = tnh[:, 2 * H:3 * H]
        o_g = sig[:, 3 * H:4 * H]
        c = f_g * c + i_g * g_g
        h = o_g * jnp.tanh(c)

    # Fused fc_sbp / fc_dbp heads on the last hidden state (single tiny store).
    out_ref[...] = (
        jnp.dot(h, wout_ref[...], preferred_element_type=jnp.float32)
        + bout_ref[...]
    )


def lstm_regressor_forward(x, params):
    """x: (B, T, D) float32 (batch_first, like the PyTorch module)."""
    B, T, D = x.shape

    # Only layout plumbing left in the wrapper: a ~192-byte time-major
    # flatten of the raw input (row index = t*B + b).
    x_tm = jnp.transpose(x, (1, 0, 2)).reshape(T * B, D).astype(jnp.float32)

    vmem = pl.BlockSpec(memory_space=pltpu.MemorySpace.VMEM)
    out = pl.pallas_call(
        functools.partial(lstm_regressor_kernel, seq_len=T, batch=B),
        out_shape=jax.ShapeDtypeStruct((B, 2), jnp.float32),
        in_specs=[vmem] * 6,
        out_specs=vmem,
    )(
        x_tm,                # (T*B, D)
        params["w_ih"],      # (D, 4H)  f32
        params["b"],         # (1, 4H)  f32
        params["w_hh"],      # (H, 4H)  bf16
        params["w_out"],     # (H, 2)   f32
        params["b_out"],     # (1, 2)   f32
    )
    sbp = out[:, 0:1]
    dbp = out[:, 1:2]
    return sbp, dbp


def init_params(key, input_size=3, hidden_size=64):
    """Deterministic synthetic parameters.

    Returns (raw, kernel_params):
      raw           : PyTorch nn.LSTM / nn.Linear layout — weight_ih (4H, D),
                      weight_hh (4H, H), gate order [i, f, g, o], heads (1, H).
      kernel_params : pre-transposed / pre-folded layout consumed by the kernel
                      (W_hh cast to bf16 for the MXU).
    """
    H, D = hidden_size, input_size
    k = jax.random.split(key, 8)
    s = 1.0 / jnp.sqrt(H)
    raw = {
        "w_ih": jax.random.uniform(k[0], (4 * H, D), jnp.float32, -s, s),
        "w_hh": jax.random.uniform(k[1], (4 * H, H), jnp.float32, -s, s),
        "b_ih": jax.random.uniform(k[2], (4 * H,), jnp.float32, -s, s),
        "b_hh": jax.random.uniform(k[3], (4 * H,), jnp.float32, -s, s),
        "w_sbp": jax.random.uniform(k[4], (1, H), jnp.float32, -s, s),
        "b_sbp": jax.random.uniform(k[5], (1,), jnp.float32, -s, s),
        "w_dbp": jax.random.uniform(k[6], (1, H), jnp.float32, -s, s),
        "b_dbp": jax.random.uniform(k[7], (1,), jnp.float32, -s, s),
    }
    kernel_params = {
        "w_ih": raw["w_ih"].T,                                        # (D, 4H)
        "b": (raw["b_ih"] + raw["b_hh"]).reshape(1, 4 * H),           # (1, 4H)
        "w_hh": raw["w_hh"].T.astype(jnp.bfloat16),                   # (H, 4H)
        "w_out": jnp.concatenate([raw["w_sbp"], raw["w_dbp"]], 0).T,  # (H, 2)
        "b_out": jnp.concatenate([raw["b_sbp"], raw["b_dbp"]]).reshape(1, 2),
    }
    return raw, kernel_params


def reference_forward(x, raw):
    """Pure-JAX reference consuming the RAW PyTorch-layout weights
    (gate order [i, f, g, o], weight_ih (4H, D), weight_hh (4H, H))."""
    B, T, D = x.shape
    H = raw["w_hh"].shape[1]
    h = jnp.zeros((B, H), jnp.float32)
    c = jnp.zeros((B, H), jnp.float32)
    for t in range(T):
        gates = (x[:, t, :] @ raw["w_ih"].T + h @ raw["w_hh"].T
                 + raw["b_ih"] + raw["b_hh"])
        i_g = jax.nn.sigmoid(gates[:, 0 * H:1 * H])
        f_g = jax.nn.sigmoid(gates[:, 1 * H:2 * H])
        g_g = jnp.tanh(gates[:, 2 * H:3 * H])
        o_g = jax.nn.sigmoid(gates[:, 3 * H:4 * H])
        c = f_g * c + i_g * g_g
        h = o_g * jnp.tanh(c)
    sbp = h @ raw["w_sbp"].T + raw["b_sbp"]
    dbp = h @ raw["w_dbp"].T + raw["b_dbp"]
    return sbp, dbp


if __name__ == "__main__":
    B, T, D, H = 2, 8, 3, 64  # batch, seq len, input_size, hidden_size

    key = jax.random.PRNGKey(0)
    k_x, k_p = jax.random.split(key)
    x = jax.random.normal(k_x, (B, T, D), jnp.float32)
    raw, params = init_params(k_p, input_size=D, hidden_size=H)

    sbp, dbp = jax.jit(lstm_regressor_forward)(x, params)
    jax.block_until_ready((sbp, dbp))

    sbp_ref, dbp_ref = reference_forward(x, raw)
    assert sbp.shape == (B, 1) and dbp.shape == (B, 1)
    # bf16 MXU operands on the recurrent matmul -> ~1e-3-scale tolerance.
    assert jnp.allclose(sbp, sbp_ref, atol=2e-3, rtol=2e-3)
    assert jnp.allclose(dbp, dbp_ref, atol=2e-3, rtol=2e-3)

    print("KERNEL_OK")
</pallas_src>

<mosaic_0001>
module attributes {stable_mosaic.version = 11 : i64} {
  func.func @lstm_regressor_kernel(%arg0: memref<16x3xf32, #tpu.memory_space<vmem>>, %arg1: memref<3x256xf32, #tpu.memory_space<vmem>>, %arg2: memref<1x256xf32, #tpu.memory_space<vmem>>, %arg3: memref<64x256xbf16, #tpu.memory_space<vmem>>, %arg4: memref<64x2xf32, #tpu.memory_space<vmem>>, %arg5: memref<1x2xf32, #tpu.memory_space<vmem>>, %arg6: memref<2x2xf32, #tpu.memory_space<vmem>>) attributes {dimension_semantics = [], scalar_prefetch = 0 : i64, scratch_operands = 0 : i64, tpu.core_type = #tpu.core_type<tc>} {
    %c0 = arith.constant 0 : index
    %c0_0 = arith.constant 0 : index
    %0 = vector.load %arg0[%c0, %c0_0] : memref<16x3xf32, #tpu.memory_space<vmem>>, vector<16x3xf32>
    %c0_1 = arith.constant 0 : index
    %c0_2 = arith.constant 0 : index
    %1 = vector.load %arg1[%c0_1, %c0_2] : memref<3x256xf32, #tpu.memory_space<vmem>>, vector<3x256xf32>
    %cst = arith.constant dense<0.000000e+00> : vector<16x256xf32>
    %2 = tpu.matmul %0, %1, %cst {dimension_numbers = #tpu.dot_dimension_numbers<[1], [0], [0], [1], [0, 0, 1, 1], [], []>} : vector<16x3xf32>, vector<3x256xf32>, vector<16x256xf32> -> vector<16x256xf32>
    %c0_3 = arith.constant 0 : index
    %c0_4 = arith.constant 0 : index
    %3 = vector.load %arg2[%c0_3, %c0_4] : memref<1x256xf32, #tpu.memory_space<vmem>>, vector<1x256xf32>
    %4 = vector.broadcast %3 : vector<1x256xf32> to vector<16x256xf32>
    %5 = arith.addf %2, %4 : vector<16x256xf32>
    %c0_5 = arith.constant 0 : index
    %c0_6 = arith.constant 0 : index
    %6 = vector.load %arg3[%c0_5, %c0_6] : memref<64x256xbf16, #tpu.memory_space<vmem>>, vector<64x256xbf16>
    %cst_7 = arith.constant 0.000000e+00 : f32
    %7 = vector.broadcast %cst_7 : f32 to vector<2x64xf32>
    %cst_8 = arith.constant 0.000000e+00 : f32
    %8 = vector.broadcast %cst_8 : f32 to vector<2x64xf32>
    %9 = vector.extract_strided_slice %5 {offsets = [0, 0], sizes = [2, 256], strides = [1, 1]} : vector<16x256xf32> to vector<2x256xf32>
    %10 = arith.truncf %7 : vector<2x64xf32> to vector<2x64xbf16>
    %cst_9 = arith.constant dense<0.000000e+00> : vector<2x256xf32>
    %11 = tpu.matmul %10, %6, %cst_9 {dimension_numbers = #tpu.dot_dimension_numbers<[1], [0], [0], [1], [0, 0, 1, 1], [], []>} : vector<2x64xbf16>, vector<64x256xbf16>, vector<2x256xf32> -> vector<2x256xf32>
    %12 = arith.addf %9, %11 : vector<2x256xf32>
    %13 = arith.negf %12 : vector<2x256xf32>
    %14 = math.exp %13 : vector<2x256xf32>
    %cst_10 = arith.constant 1.000000e+00 : f32
    %15 = vector.broadcast %cst_10 : f32 to vector<2x256xf32>
    %16 = arith.addf %15, %14 : vector<2x256xf32>
    %17 = arith.divf %15, %16 : vector<2x256xf32>
    %18 = math.tanh %12 : vector<2x256xf32>
    %19 = vector.extract_strided_slice %17 {offsets = [0, 0], sizes = [2, 64], strides = [1, 1]} : vector<2x256xf32> to vector<2x64xf32>
    %20 = vector.extract_strided_slice %17 {offsets = [0, 64], sizes = [2, 64], strides = [1, 1]} : vector<2x256xf32> to vector<2x64xf32>
    %21 = vector.extract_strided_slice %18 {offsets = [0, 128], sizes = [2, 64], strides = [1, 1]} : vector<2x256xf32> to vector<2x64xf32>
    %22 = vector.extract_strided_slice %17 {offsets = [0, 192], sizes = [2, 64], strides = [1, 1]} : vector<2x256xf32> to vector<2x64xf32>
    %23 = arith.mulf %20, %8 : vector<2x64xf32>
    %24 = arith.mulf %19, %21 : vector<2x64xf32>
    %25 = arith.addf %23, %24 : vector<2x64xf32>
    %26 = math.tanh %25 : vector<2x64xf32>
    %27 = arith.mulf %22, %26 : vector<2x64xf32>
    %28 = vector.extract_strided_slice %5 {offsets = [2, 0], sizes = [2, 256], strides = [1, 1]} : vector<16x256xf32> to vector<2x256xf32>
    %29 = arith.truncf %27 : vector<2x64xf32> to vector<2x64xbf16>
    %cst_11 = arith.constant dense<0.000000e+00> : vector<2x256xf32>
    %30 = tpu.matmul %29, %6, %cst_11 {dimension_numbers = #tpu.dot_dimension_numbers<[1], [0], [0], [1], [0, 0, 1, 1], [], []>} : vector<2x64xbf16>, vector<64x256xbf16>, vector<2x256xf32> -> vector<2x256xf32>
    %31 = arith.addf %28, %30 : vector<2x256xf32>
    %32 = arith.negf %31 : vector<2x256xf32>
    %33 = math.exp %32 : vector<2x256xf32>
    %cst_12 = arith.constant 1.000000e+00 : f32
    %34 = vector.broadcast %cst_12 : f32 to vector<2x256xf32>
    %35 = arith.addf %34, %33 : vector<2x256xf32>
    %36 = arith.divf %34, %35 : vector<2x256xf32>
    %37 = math.tanh %31 : vector<2x256xf32>
    %38 = vector.extract_strided_slice %36 {offsets = [0, 0], sizes = [2, 64], strides = [1, 1]} : vector<2x256xf32> to vector<2x64xf32>
    %39 = vector.extract_strided_slice %36 {offsets = [0, 64], sizes = [2, 64], strides = [1, 1]} : vector<2x256xf32> to vector<2x64xf32>
    %40 = vector.extract_strided_slice %37 {offsets = [0, 128], sizes = [2, 64], strides = [1, 1]} : vector<2x256xf32> to vector<2x64xf32>
    %41 = vector.extract_strided_slice %36 {offsets = [0, 192], sizes = [2, 64], strides = [1, 1]} : vector<2x256xf32> to vector<2x64xf32>
    %42 = arith.mulf %39, %25 : vector<2x64xf32>
    %43 = arith.mulf %38, %40 : vector<2x64xf32>
    %44 = arith.addf %42, %43 : vector<2x64xf32>
    %45 = math.tanh %44 : vector<2x64xf32>
    %46 = arith.mulf %41, %45 : vector<2x64xf32>
    %47 = vector.extract_strided_slice %5 {offsets = [4, 0], sizes = [2, 256], strides = [1, 1]} : vector<16x256xf32> to vector<2x256xf32>
    %48 = arith.truncf %46 : vector<2x64xf32> to vector<2x64xbf16>
    %cst_13 = arith.constant dense<0.000000e+00> : vector<2x256xf32>
    %49 = tpu.matmul %48, %6, %cst_13 {dimension_numbers = #tpu.dot_dimension_numbers<[1], [0], [0], [1], [0, 0, 1, 1], [], []>} : vector<2x64xbf16>, vector<64x256xbf16>, vector<2x256xf32> -> vector<2x256xf32>
    %50 = arith.addf %47, %49 : vector<2x256xf32>
    %51 = arith.negf %50 : vector<2x256xf32>
    %52 = math.exp %51 : vector<2x256xf32>
    %cst_14 = arith.constant 1.000000e+00 : f32
    %53 = vector.broadcast %cst_14 : f32 to vector<2x256xf32>
    %54 = arith.addf %53, %52 : vector<2x256xf32>
    %55 = arith.divf %53, %54 : vector<2x256xf32>
    %56 = math.tanh %50 : vector<2x256xf32>
    %57 = vector.extract_strided_slice %55 {offsets = [0, 0], sizes = [2, 64], strides = [1, 1]} : vector<2x256xf32> to vector<2x64xf32>
    %58 = vector.extract_strided_slice %55 {offsets = [0, 64], sizes = [2, 64], strides = [1, 1]} : vector<2x256xf32> to vector<2x64xf32>
    %59 = vector.extract_strided_slice %56 {offsets = [0, 128], sizes = [2, 64], strides = [1, 1]} : vector<2x256xf32> to vector<2x64xf32>
    %60 = vector.extract_strided_slice %55 {offsets = [0, 192], sizes = [2, 64], strides = [1, 1]} : vector<2x256xf32> to vector<2x64xf32>
    %61 = arith.mulf %58, %44 : vector<2x64xf32>
    %62 = arith.mulf %57, %59 : vector<2x64xf32>
    %63 = arith.addf %61, %62 : vector<2x64xf32>
    %64 = math.tanh %63 : vector<2x64xf32>
    %65 = arith.mulf %60, %64 : vector<2x64xf32>
    %66 = vector.extract_strided_slice %5 {offsets = [6, 0], sizes = [2, 256], strides = [1, 1]} : vector<16x256xf32> to vector<2x256xf32>
    %67 = arith.truncf %65 : vector<2x64xf32> to vector<2x64xbf16>
    %cst_15 = arith.constant dense<0.000000e+00> : vector<2x256xf32>
    %68 = tpu.matmul %67, %6, %cst_15 {dimension_numbers = #tpu.dot_dimension_numbers<[1], [0], [0], [1], [0, 0, 1, 1], [], []>} : vector<2x64xbf16>, vector<64x256xbf16>, vector<2x256xf32> -> vector<2x256xf32>
    %69 = arith.addf %66, %68 : vector<2x256xf32>
    %70 = arith.negf %69 : vector<2x256xf32>
    %71 = math.exp %70 : vector<2x256xf32>
    %cst_16 = arith.constant 1.000000e+00 : f32
    %72 = vector.broadcast %cst_16 : f32 to vector<2x256xf32>
    %73 = arith.addf %72, %71 : vector<2x256xf32>
    %74 = arith.divf %72, %73 : vector<2x256xf32>
    %75 = math.tanh %69 : vector<2x256xf32>
    %76 = vector.extract_strided_slice %74 {offsets = [0, 0], sizes = [2, 64], strides = [1, 1]} : vector<2x256xf32> to vector<2x64xf32>
    %77 = vector.extract_strided_slice %74 {offsets = [0, 64], sizes = [2, 64], strides = [1, 1]} : vector<2x256xf32> to vector<2x64xf32>
    %78 = vector.extract_strided_slice %75 {offsets = [0, 128], sizes = [2, 64], strides = [1, 1]} : vector<2x256xf32> to vector<2x64xf32>
    %79 = vector.extract_strided_slice %74 {offsets = [0, 192], sizes = [2, 64], strides = [1, 1]} : vector<2x256xf32> to vector<2x64xf32>
    %80 = arith.mulf %77, %63 : vector<2x64xf32>
    %81 = arith.mulf %76, %78 : vector<2x64xf32>
    %82 = arith.addf %80, %81 : vector<2x64xf32>
    %83 = math.tanh %82 : vector<2x64xf32>
    %84 = arith.mulf %79, %83 : vector<2x64xf32>
    %85 = vector.extract_strided_slice %5 {offsets = [8, 0], sizes = [2, 256], strides = [1, 1]} : vector<16x256xf32> to vector<2x256xf32>
    %86 = arith.truncf %84 : vector<2x64xf32> to vector<2x64xbf16>
    %cst_17 = arith.constant dense<0.000000e+00> : vector<2x256xf32>
    %87 = tpu.matmul %86, %6, %cst_17 {dimension_numbers = #tpu.dot_dimension_numbers<[1], [0], [0], [1], [0, 0, 1, 1], [], []>} : vector<2x64xbf16>, vector<64x256xbf16>, vector<2x256xf32> -> vector<2x256xf32>
    %88 = arith.addf %85, %87 : vector<2x256xf32>
    %89 = arith.negf %88 : vector<2x256xf32>
    %90 = math.exp %89 : vector<2x256xf32>
    %cst_18 = arith.constant 1.000000e+00 : f32
    %91 = vector.broadcast %cst_18 : f32 to vector<2x256xf32>
    %92 = arith.addf %91, %90 : vector<2x256xf32>
    %93 = arith.divf %91, %92 : vector<2x256xf32>
    %94 = math.tanh %88 : vector<2x256xf32>
    %95 = vector.extract_strided_slice %93 {offsets = [0, 0], sizes = [2, 64], strides = [1, 1]} : vector<2x256xf32> to vector<2x64xf32>
    %96 = vector.extract_strided_slice %93 {offsets = [0, 64], sizes = [2, 64], strides = [1, 1]} : vector<2x256xf32> to vector<2x64xf32>
    %97 = vector.extract_strided_slice %94 {offsets = [0, 128], sizes = [2, 64], strides = [1, 1]} : vector<2x256xf32> to vector<2x64xf32>
    %98 = vector.extract_strided_slice %93 {offsets = [0, 192], sizes = [2, 64], strides = [1, 1]} : vector<2x256xf32> to vector<2x64xf32>
    %99 = arith.mulf %96, %82 : vector<2x64xf32>
    %100 = arith.mulf %95, %97 : vector<2x64xf32>
    %101 = arith.addf %99, %100 : vector<2x64xf32>
    %102 = math.tanh %101 : vector<2x64xf32>
    %103 = arith.mulf %98, %102 : vector<2x64xf32>
    %104 = vector.extract_strided_slice %5 {offsets = [10, 0], sizes = [2, 256], strides = [1, 1]} : vector<16x256xf32> to vector<2x256xf32>
    %105 = arith.truncf %103 : vector<2x64xf32> to vector<2x64xbf16>
    %cst_19 = arith.constant dense<0.000000e+00> : vector<2x256xf32>
    %106 = tpu.matmul %105, %6, %cst_19 {dimension_numbers = #tpu.dot_dimension_numbers<[1], [0], [0], [1], [0, 0, 1, 1], [], []>} : vector<2x64xbf16>, vector<64x256xbf16>, vector<2x256xf32> -> vector<2x256xf32>
    %107 = arith.addf %104, %106 : vector<2x256xf32>
    %108 = arith.negf %107 : vector<2x256xf32>
    %109 = math.exp %108 : vector<2x256xf32>
    %cst_20 = arith.constant 1.000000e+00 : f32
    %110 = vector.broadcast %cst_20 : f32 to vector<2x256xf32>
    %111 = arith.addf %110, %109 : vector<2x256xf32>
    %112 = arith.divf %110, %111 : vector<2x256xf32>
    %113 = math.tanh %107 : vector<2x256xf32>
    %114 = vector.extract_strided_slice %112 {offsets = [0, 0], sizes = [2, 64], strides = [1, 1]} : vector<2x256xf32> to vector<2x64xf32>
    %115 = vector.extract_strided_slice %112 {offsets = [0, 64], sizes = [2, 64], strides = [1, 1]} : vector<2x256xf32> to vector<2x64xf32>
    %116 = vector.extract_strided_slice %113 {offsets = [0, 128], sizes = [2, 64], strides = [1, 1]} : vector<2x256xf32> to vector<2x64xf32>
    %117 = vector.extract_strided_slice %112 {offsets = [0, 192], sizes = [2, 64], strides = [1, 1]} : vector<2x256xf32> to vector<2x64xf32>
    %118 = arith.mulf %115, %101 : vector<2x64xf32>
    %119 = arith.mulf %114, %116 : vector<2x64xf32>
    %120 = arith.addf %118, %119 : vector<2x64xf32>
    %121 = math.tanh %120 : vector<2x64xf32>
    %122 = arith.mulf %117, %121 : vector<2x64xf32>
    %123 = vector.extract_strided_slice %5 {offsets = [12, 0], sizes = [2, 256], strides = [1, 1]} : vector<16x256xf32> to vector<2x256xf32>
    %124 = arith.truncf %122 : vector<2x64xf32> to vector<2x64xbf16>
    %cst_21 = arith.constant dense<0.000000e+00> : vector<2x256xf32>
    %125 = tpu.matmul %124, %6, %cst_21 {dimension_numbers = #tpu.dot_dimension_numbers<[1], [0], [0], [1], [0, 0, 1, 1], [], []>} : vector<2x64xbf16>, vector<64x256xbf16>, vector<2x256xf32> -> vector<2x256xf32>
    %126 = arith.addf %123, %125 : vector<2x256xf32>
    %127 = arith.negf %126 : vector<2x256xf32>
    %128 = math.exp %127 : vector<2x256xf32>
    %cst_22 = arith.constant 1.000000e+00 : f32
    %129 = vector.broadcast %cst_22 : f32 to vector<2x256xf32>
    %130 = arith.addf %129, %128 : vector<2x256xf32>
    %131 = arith.divf %129, %130 : vector<2x256xf32>
    %132 = math.tanh %126 : vector<2x256xf32>
    %133 = vector.extract_strided_slice %131 {offsets = [0, 0], sizes = [2, 64], strides = [1, 1]} : vector<2x256xf32> to vector<2x64xf32>
    %134 = vector.extract_strided_slice %131 {offsets = [0, 64], sizes = [2, 64], strides = [1, 1]} : vector<2x256xf32> to vector<2x64xf32>
    %135 = vector.extract_strided_slice %132 {offsets = [0, 128], sizes = [2, 64], strides = [1, 1]} : vector<2x256xf32> to vector<2x64xf32>
    %136 = vector.extract_strided_slice %131 {offsets = [0, 192], sizes = [2, 64], strides = [1, 1]} : vector<2x256xf32> to vector<2x64xf32>
    %137 = arith.mulf %134, %120 : vector<2x64xf32>
    %138 = arith.mulf %133, %135 : vector<2x64xf32>
    %139 = arith.addf %137, %138 : vector<2x64xf32>
    %140 = math.tanh %139 : vector<2x64xf32>
    %141 = arith.mulf %136, %140 : vector<2x64xf32>
    %142 = vector.extract_strided_slice %5 {offsets = [14, 0], sizes = [2, 256], strides = [1, 1]} : vector<16x256xf32> to vector<2x256xf32>
    %143 = arith.truncf %141 : vector<2x64xf32> to vector<2x64xbf16>
    %cst_23 = arith.constant dense<0.000000e+00> : vector<2x256xf32>
    %144 = tpu.matmul %143, %6, %cst_23 {dimension_numbers = #tpu.dot_dimension_numbers<[1], [0], [0], [1], [0, 0, 1, 1], [], []>} : vector<2x64xbf16>, vector<64x256xbf16>, vector<2x256xf32> -> vector<2x256xf32>
    %145 = arith.addf %142, %144 : vector<2x256xf32>
    %146 = arith.negf %145 : vector<2x256xf32>
    %147 = math.exp %146 : vector<2x256xf32>
    %cst_24 = arith.constant 1.000000e+00 : f32
    %148 = vector.broadcast %cst_24 : f32 to vector<2x256xf32>
    %149 = arith.addf %148, %147 : vector<2x256xf32>
    %150 = arith.divf %148, %149 : vector<2x256xf32>
    %151 = math.tanh %145 : vector<2x256xf32>
    %152 = vector.extract_strided_slice %150 {offsets = [0, 0], sizes = [2, 64], strides = [1, 1]} : vector<2x256xf32> to vector<2x64xf32>
    %153 = vector.extract_strided_slice %150 {offsets = [0, 64], sizes = [2, 64], strides = [1, 1]} : vector<2x256xf32> to vector<2x64xf32>
    %154 = vector.extract_strided_slice %151 {offsets = [0, 128], sizes = [2, 64], strides = [1, 1]} : vector<2x256xf32> to vector<2x64xf32>
    %155 = vector.extract_strided_slice %150 {offsets = [0, 192], sizes = [2, 64], strides = [1, 1]} : vector<2x256xf32> to vector<2x64xf32>
    %156 = arith.mulf %153, %139 : vector<2x64xf32>
    %157 = arith.mulf %152, %154 : vector<2x64xf32>
    %158 = arith.addf %156, %157 : vector<2x64xf32>
    %159 = math.tanh %158 : vector<2x64xf32>
    %160 = arith.mulf %155, %159 : vector<2x64xf32>
    %c0_25 = arith.constant 0 : index
    %c0_26 = arith.constant 0 : index
    %161 = vector.load %arg4[%c0_25, %c0_26] : memref<64x2xf32, #tpu.memory_space<vmem>>, vector<64x2xf32>
    %cst_27 = arith.constant dense<0.000000e+00> : vector<2x2xf32>
    %162 = tpu.matmul %160, %161, %cst_27 {dimension_numbers = #tpu.dot_dimension_numbers<[1], [0], [0], [1], [0, 0, 1, 1], [], []>} : vector<2x64xf32>, vector<64x2xf32>, vector<2x2xf32> -> vector<2x2xf32>
    %c0_28 = arith.constant 0 : index
    %c0_29 = arith.constant 0 : index
    %163 = vector.load %arg5[%c0_28, %c0_29] : memref<1x2xf32, #tpu.memory_space<vmem>>, vector<1x2xf32>
    %164 = vector.broadcast %163 : vector<1x2xf32> to vector<2x2xf32>
    %165 = arith.addf %162, %164 : vector<2x2xf32>
    %c0_30 = arith.constant 0 : index
    %c0_31 = arith.constant 0 : index
    %166 = vector.load %arg6[%c0_30, %c0_31] : memref<2x2xf32, #tpu.memory_space<vmem>>, vector<2x2xf32>
    tpu.vector_store %arg6[%c0_30, %c0_31], %165 {strides = array<i32>} : memref<2x2xf32, #tpu.memory_space<vmem>>, vector<2x2xf32>,
    return
  }
}

</mosaic_0001>

<bundles_post_ra>
// kernel: lstm_regressor_forward.1
= control target key start
LH: loop header
LB: loop body
LE: loop exit
PB: predicated region body
PF: predicated region fallthrough
CT: control target
= control target key end

     0   :  { %v1088_v1 = vmov 0.0   ;;  %v1089_v2 = vmov 0   ;;  %vm48_vm0 = vcmask 1042432   ;;  %vm41_vm1 = vcmask 23552   ;;  %s1357_s3 = inlined_call_operand.vmem [shape: bf16[64,256], index: 3, kind: input, shape index: {}]   ;;  %s1358_s1 = inlined_call_operand.vmem [shape: f32[3,256], index: 1, kind: input, shape index: {}]   ;;  %s1359_s0 = inlined_call_operand.vmem [shape: f32[16,3], index: 0, kind: input, shape index: {}]   ;;  %s1360_s2 = inlined_call_operand.vmem [shape: f32[1,256], index: 2, kind: input, shape index: {}]   ;;  %s1361_s4 = inlined_call_operand.vmem [shape: f32[64,2], index: 4, kind: input, shape index: {}]   ;;  %s1362_s5 = inlined_call_operand.vmem [shape: f32[1,2], index: 5, kind: input, shape index: {}]   ;;  %s1363_s6 = inlined_call_operand.vmem [shape: f32[2,2], index: 6, kind: output, shape index: {}]  }
   0x1   :  { %v1130_v0 = vld [vmem:[%s1357_s3 + $0x34] ss:$8 sps:$4 sm:$0xff]   ;;  %117 = vmatprep.mubr.f32.mxu0 %v1088_v1  ;;  %214 = vmatprep.mubr.bf16.mxu1 %v1089_v2  ;;  %v1137_v3 = vld [vmem:[%s1357_s3 + $0x30] ss:$8 sps:$4 sm:$0xff]   ;;  %v1143_v4 = vld [vmem:[%s1357_s3 + $0x24] ss:$8 sps:$4 sm:$0xff]   ;;  %v29_v13 = vlaneseq }
   0x2   :  { %190 = vmatprep.subr.bf16.mxu1 %v1130_v0  ;;  %v1149_v5 = vld [vmem:[%s1357_s3 + $0x20] ss:$8 sps:$4 sm:$0xff]   ;;  %v1155_v6 = vld [vmem:[%s1357_s3 + $0x14] ss:$8 sps:$4 sm:$0xff]   ;;  %v1167_v10 = vld [vmem:[%s1357_s3 + $0x10] ss:$8 sps:$4 sm:$0xff]  }
   0x3   :  { %191 = vmatpush1.bf16.msra.mxu1 %v1137_v3  ;;  %v26_v7 = vld [vmem:[%s1358_s1] sm:$0x77]  ;;  %v30_v14 = vshrl.u32 %v29_v13, 7  ;;  %v25_v36 = vld [vmem:[%s1359_s0 + $0x8] sm:$0xff]  ;;  %vm178_vm2 = vcmask 523264   ;;  %vm1091_vm3 = vmmov 0  }
   0x4   :  { %192 = vmatprep.subr.bf16.mxu1 %v1143_v4  ;;  %v40_v8 = vcombine.high %v26_v7, %v26_v7  ;;  %v24_v9 = vld [vmem:[%s1359_s0] sm:$0xff]  ;;  %vm904_vm4 = vcmask 9216  }
   0x5   :  { %v1173_v11 = vld [vmem:[%s1357_s3 + $0x4] ss:$8 sps:$4 sm:$0xff]   ;;  %v1183_v12 = vld [vmem:[%s1357_s3] ss:$8 sps:$4 sm:$0xff]   ;;  %v31_v15 = vsub.s32 0, %v30_v14  ;;  %v35_v25 = vsub.s32 1, %v30_v14 }
   0x6   :  { %910 = vmatprep.subr.msk.mxu0 %vm48_vm0, %v40_v8  ;;  %v27_v16 = vld [vmem:[%s1360_s2] sm:$0x3]  ;;  %s1090_s2 = smov 64  }
   0x7   :  { %193 = vmatpush1.bf16.msra.mxu1 %v1149_v5  ;;  %911 = vmatpush1.msk.msra.mxu0 %vm48_vm0, %v26_v7  ;;  %v1208_v17 = vrot.slane %v27_v16, %v31_v15  ;;  %v1214_v27 = vrot.slane %v27_v16, %v35_v25 }
   0x8   :  { %194 = vmatprep.subr.bf16.mxu1 %v1155_v6  ;;  %912 = vmatmul.mubr.msk.f32.vlgmr.msra.gmra.mxu0 %vm41_vm1, %v24_v9 }
   0x9   :  { %262 = vmatprep.subr.bf16.mxu0 %v1130_v0  ;;  %123 = vmatprep.mubr.f32.mxu0 %v1088_v1 }
   0xa   :  { %263 = vmatpush1.bf16.msra.mxu0 %v1137_v3 }
   0xb   :  { %195 = vmatpush1.bf16.msra.mxu1 %v1167_v10  ;;  %264 = vmatprep.subr.bf16.mxu0 %v1143_v4 }
   0xc   :  { %196 = vmatprep.subr.bf16.mxu1 %v1173_v11  ;;  %913 = vmatmul.mubr.msk.f32.gmra.mxu0 %vm41_vm1, %v25_v36 }
   0xd   :  { %286 = vmatprep.mubr.bf16.mxu0 %v1089_v2 }
   0xe   :  { %265 = vmatpush1.bf16.msra.mxu0 %v1149_v5 }
   0xf   :  { %197 = vmatpush1.bf16.msra.mxu1 %v1183_v12  ;;  %266 = vmatprep.subr.bf16.mxu0 %v1155_v6 }
  0x10   :  { %344 = vmatprep.subr.bf16.mxu1 %v1130_v0 }
  0x12   :  { %215 = vmatmul.mubr.bf16.vlgmr.msra.gmra.mxu1 %v1089_v2  ;;  %267 = vmatpush1.bf16.msra.mxu0 %v1167_v10 }
  0x13   :  { %268 = vmatprep.subr.bf16.mxu0 %v1173_v11  ;;  %345 = vmatpush1.bf16.msra.mxu1 %v1137_v3 }
  0x14   :  { %346 = vmatprep.subr.bf16.mxu1 %v1143_v4  ;;  %368 = vmatprep.mubr.bf16.mxu1 %v1089_v2 }
  0x16   :  { %269 = vmatpush1.bf16.msra.mxu0 %v1183_v12 }
  0x17   :  { %347 = vmatpush1.bf16.msra.mxu1 %v1149_v5  ;;  %426 = vmatprep.subr.bf16.mxu0 %v1130_v0 }
  0x18   :  { %348 = vmatprep.subr.bf16.mxu1 %v1155_v6 }
  0x1b   :  { %349 = vmatpush1.bf16.msra.mxu1 %v1167_v10 }
  0x1c   :  { %350 = vmatprep.subr.bf16.mxu1 %v1173_v11 }
  0x1f   :  { %351 = vmatpush1.bf16.msra.mxu1 %v1183_v12 }
  0x20   :  { %508 = vmatprep.subr.bf16.mxu1 %v1130_v0 }
  0xc8   :  { %v119_v18 = vpop.f32.mrf.mxu0 }
  0xc9   :  { %v1211_v19 = vadd.f32 %v119_v18, %v1208_v17 }
  0xca   :  { %v121_v28 = vpop.f32.mrf.mxu0 }
  0xcb   :  { %v1217_v29 = vadd.f32 %v121_v28, %v1214_v27 }
  0xcc   :  { %v1237_v48 = vpop.f32.mrf.mxu0 }
  0xce   :  { %v1239_v49 = vpop.f32.mrf.mxu0 }
  0xd2   :  { %v216_v20 = vpop.f32.mrf.mxu1 }
  0xd3   :  { %v223_v21 = vadd.f32 %v216_v20, %v1211_v19 }
  0xd4   :  { %v218_v22 = vpop.f32.mrf.mxu1 }
  0xd5   :  { %v922_v23 = vmul.f32 -1.442695, %v223_v21  ;;  %v224_v30 = vadd.f32 %v218_v22, %v1217_v29 }
  0xd6   :  { %v220_v24 = vpop.f32.mrf.mxu1 }
  0xd7   :  { %992 = vpow2.f32 %v922_v23  ;;  %v923_v37 = vmul.f32 -1.442695, %v224_v30 }
  0xd8   :  { %v221_v26 = vpop.f32.mrf.mxu1  ;;  %994 = vtanh.f32 %v224_v30 }
  0xe4   :  { %v993_v31 = vpop.eup %992 }
  0xe5   :  { %v231_v32 = vadd.f32 1.0, %v993_v31  ;;  %v995_v33 = vpop.eup %994 }
  0xe7   :  { %996 = vrcp.f32 %v231_v32 }
  0xe8   :  { %998 = vpow2.f32 %v923_v37 }
  0xf4   :  { %v997_v34 = vpop.eup %996 }
  0xf5   :  { %v239_v35 = vmul.f32 %v997_v34, %v995_v33  ;;  %v999_v38 = vpop.eup %998  ;;  %v238_v40 = vmul.f32 0.0, %v997_v34 }
  0xf6   :  { %v232_v39 = vadd.f32 1.0, %v999_v38 }
  0xf7   :  { %241 = vrot.lane.b32.xlu0 %v239_v35, %s1090_s2 }
  0xf8   :  { %1000 = vrcp.f32 %v232_v39 }
 0x105   :  { %v1001_v43 = vpop.eup %1000 }
 0x169   :  { %v242_v41 = vpop.permute.xlu0 %241 }
 0x16a   :  { %v244_v42 = vadd.f32 %v242_v41, %v238_v40 }
 0x16c   :  { %1002 = vtanh.f32 %v244_v42  ;;  %v317_v62 = vrot.slane %v244_v42, 6 }
 0x179   :  { %v1003_v44 = vpop.eup %1002 }
 0x17a   :  { %v246_v45 = vmul.f32 %v1003_v44, %v1001_v43 }
 0x17c   :  { %v247_v46 = vpack.c.bf16 %v246_v45, %v246_v45 }
 0x17e   :  { %249 = vrot.lane.b32.xlu0 %v247_v46, %s1090_s2 }
 0x1f0   :  { %v250_v47 = vpop.permute.xlu0 %249 }
 0x1f1   :  { %924 = vmatmul.mubr.msk.bf16.vlgmr.msra.gmra.mxu0 %vm178_vm2, %v250_v47 }
 0x1f2   :  { %427 = vmatpush1.bf16.msra.mxu0 %v1137_v3  ;;  %450 = vmatprep.mubr.bf16.mxu0 %v1089_v2 }
 0x1f3   :  { %428 = vmatprep.subr.bf16.mxu0 %v1143_v4 }
 0x1f6   :  { %429 = vmatpush1.bf16.msra.mxu0 %v1149_v5 }
 0x1f7   :  { %430 = vmatprep.subr.bf16.mxu0 %v1155_v6 }
 0x1fa   :  { %431 = vmatpush1.bf16.msra.mxu0 %v1167_v10 }
 0x1fb   :  { %432 = vmatprep.subr.bf16.mxu0 %v1173_v11 }
 0x1fe   :  { %433 = vmatpush1.bf16.msra.mxu0 %v1183_v12 }
 0x1ff   :  { %583 = vmatprep.subr.bf16.mxu0 %v1130_v0 }
 0x2b1   :  { %v288_v50 = vpop.f32.mrf.mxu0 }
 0x2b2   :  { %v297_v51 = vrot.slane %v288_v50, 6 }
 0x2b3   :  { %v290_v52 = vpop.f32.mrf.mxu0 }
 0x2b4   :  { %v301_v53 = vadd.f32 %v297_v51, %v1211_v19  ;;  %v298_v57 = vrot.slane %v290_v52, 6 }
 0x2b5   :  { %v292_v54 = vpop.f32.mrf.mxu0 }
 0x2b6   :  { %v925_v55 = vmul.f32 -1.442695, %v301_v53  ;;  %v302_v58 = vadd.f32 %v298_v57, %v1217_v29 }
 0x2b7   :  { %v293_v56 = vpop.f32.mrf.mxu0 }
 0x2b8   :  { %1004 = vpow2.f32 %v925_v55  ;;  %v926_v9 = vmul.f32 -1.442695, %v302_v58 }
 0x2b9   :  { %1006 = vtanh.f32 %v302_v58 }
 0x2c5   :  { %v1005_v59 = vpop.eup %1004 }
 0x2c6   :  { %v309_v60 = vadd.f32 1.0, %v1005_v59  ;;  %v1007_v61 = vpop.eup %1006 }
 0x2c8   :  { %1008 = vrcp.f32 %v309_v60 }
 0x2c9   :  { %1010 = vpow2.f32 %v926_v9 }
 0x2d5   :  { %v1009_v63 = vpop.eup %1008 }
 0x2d6   :  { %v320_v7 = vmul.f32 %v1009_v63, %v1007_v61  ;;  %v319_v8 = vmul.f32 %v1009_v63, %v317_v62  ;;  %v1011_v13 = vpop.eup %1010 }
 0x2d7   :  { %v310_v14 = vadd.f32 1.0, %v1011_v13 }
 0x2d8   :  { %322 = vrot.lane.b32.xlu1 %v320_v7, %s1090_s2 }
 0x2d9   :  { %1012 = vrcp.f32 %v310_v14 }
 0x2e6   :  { %v1013_v18 = vpop.eup %1012 }
 0x34a   :  { %v323_v15 = vpop.permute.xlu1 %322 }
 0x34b   :  { %v325_v16 = vadd.f32 %v323_v15, %v319_v8 }
 0x34d   :  { %1014 = vtanh.f32 %v325_v16  ;;  %v399_v39 = vrot.slane %v325_v16, 6 }
 0x35a   :  { %v1015_v20 = vpop.eup %1014 }
 0x35b   :  { %v327_v21 = vmul.f32 %v1015_v20, %v1013_v18 }
 0x35d   :  { %v328_v22 = vpack.c.bf16 %v327_v21, %v327_v21 }
 0x35f   :  { %v330_v23 = vrot.slane %v328_v22, 1 }
 0x361   :  { %331 = vrot.lane.b32.xlu1 %v330_v23, %s1090_s2 }
 0x3d3   :  { %v332_v24 = vpop.permute.xlu1 %331 }
 0x3d4   :  { %927 = vmatmul.mubr.msk.bf16.vlgmr.msra.gmra.mxu1 %vm178_vm2, %v332_v24 }
 0x3d5   :  { %509 = vmatpush1.bf16.msra.mxu1 %v1137_v3  ;;  %532 = vmatprep.mubr.bf16.mxu1 %v1089_v2 }
 0x3d6   :  { %510 = vmatprep.subr.bf16.mxu1 %v1143_v4 }
 0x3d9   :  { %511 = vmatpush1.bf16.msra.mxu1 %v1149_v5 }
 0x3da   :  { %512 = vmatprep.subr.bf16.mxu1 %v1155_v6 }
 0x3dd   :  { %513 = vmatpush1.bf16.msra.mxu1 %v1167_v10 }
 0x3de   :  { %514 = vmatprep.subr.bf16.mxu1 %v1173_v11 }
 0x3e1   :  { %515 = vmatpush1.bf16.msra.mxu1 %v1183_v12 }
 0x3e2   :  { %665 = vmatprep.subr.bf16.mxu1 %v1130_v0 }
 0x494   :  { %v370_v25 = vpop.f32.mrf.mxu1 }
 0x495   :  { %v379_v26 = vrot.slane %v370_v25, 4 }
 0x496   :  { %v372_v28 = vpop.f32.mrf.mxu1 }
 0x497   :  { %v383_v30 = vadd.f32 %v379_v26, %v1211_v19  ;;  %v380_v34 = vrot.slane %v372_v28, 4 }
 0x498   :  { %v374_v31 = vpop.f32.mrf.mxu1 }
 0x499   :  { %v928_v32 = vmul.f32 -1.442695, %v383_v30  ;;  %v384_v35 = vadd.f32 %v380_v34, %v1217_v29  ;;  %v1285_v30 = vadd.f32 %v1237_v48, %v1208_v17 }
 0x49a   :  { %v375_v33 = vpop.f32.mrf.mxu1 }
 0x49b   :  { %1016 = vpow2.f32 %v928_v32  ;;  %v929_v43 = vmul.f32 -1.442695, %v384_v35 }
 0x49c   :  { %1018 = vtanh.f32 %v384_v35 }
 0x4a8   :  { %v1017_v36 = vpop.eup %1016 }
 0x4a9   :  { %v391_v37 = vadd.f32 1.0, %v1017_v36  ;;  %v1019_v38 = vpop.eup %1018 }
 0x4ab   :  { %1020 = vrcp.f32 %v391_v37  ;;  %v1290_v37 = vadd.f32 %v1239_v49, %v1214_v27 }
 0x4ac   :  { %1022 = vpow2.f32 %v929_v43 }
 0x4b8   :  { %v1021_v40 = vpop.eup %1020 }
 0x4b9   :  { %v402_v41 = vmul.f32 %v1021_v40, %v1019_v38  ;;  %v401_v42 = vmul.f32 %v1021_v40, %v399_v39  ;;  %v1023_v44 = vpop.eup %1022 }
 0x4ba   :  { %v392_v45 = vadd.f32 1.0, %v1023_v44 }
 0x4bb   :  { %404 = vrot.lane.b32.xlu0 %v402_v41, %s1090_s2 }
 0x4bc   :  { %1024 = vrcp.f32 %v392_v45 }
 0x4c9   :  { %v1025_v50 = vpop.eup %1024 }
 0x52d   :  { %v405_v46 = vpop.permute.xlu0 %404 }
 0x52e   :  { %v407_v47 = vadd.f32 %v405_v46, %v401_v42 }
 0x530   :  { %1026 = vtanh.f32 %v407_v47  ;;  %v481_v14 = vrot.slane %v407_v47, 6 }
 0x53d   :  { %v1027_v51 = vpop.eup %1026 }
 0x53e   :  { %v409_v52 = vmul.f32 %v1027_v51, %v1025_v50 }
 0x540   :  { %v410_v53 = vpack.c.bf16 %v409_v52, %v409_v52 }
 0x542   :  { %v412_v54 = vrot.slane %v410_v53, 2 }
 0x544   :  { %413 = vrot.lane.b32.xlu1 %v412_v54, %s1090_s2 }
 0x5b6   :  { %v414_v55 = vpop.permute.xlu1 %413 }
 0x5b7   :  { %930 = vmatmul.mubr.msk.bf16.vlgmr.msra.gmra.mxu0 %vm178_vm2, %v414_v55 }
 0x5b8   :  { %584 = vmatpush1.bf16.msra.mxu0 %v1137_v3  ;;  %607 = vmatprep.mubr.bf16.mxu0 %v1089_v2 }
 0x5b9   :  { %585 = vmatprep.subr.bf16.mxu0 %v1143_v4 }
 0x5bc   :  { %586 = vmatpush1.bf16.msra.mxu0 %v1149_v5 }
 0x5bd   :  { %587 = vmatprep.subr.bf16.mxu0 %v1155_v6 }
 0x5c0   :  { %588 = vmatpush1.bf16.msra.mxu0 %v1167_v10 }
 0x5c1   :  { %589 = vmatprep.subr.bf16.mxu0 %v1173_v11 }
 0x5c4   :  { %590 = vmatpush1.bf16.msra.mxu0 %v1183_v12 }
 0x5c5   :  { %747 = vmatprep.subr.bf16.mxu0 %v1130_v0 }
 0x677   :  { %v452_v56 = vpop.f32.mrf.mxu0 }
 0x678   :  { %v461_v57 = vrot.slane %v452_v56, 2 }
 0x679   :  { %v454_v58 = vpop.f32.mrf.mxu0 }
 0x67a   :  { %v465_v59 = vadd.f32 %v461_v57, %v1211_v19  ;;  %v462_v63 = vrot.slane %v454_v58, 2 }
 0x67b   :  { %v456_v60 = vpop.f32.mrf.mxu0 }
 0x67c   :  { %v931_v61 = vmul.f32 -1.442695, %v465_v59  ;;  %v466_v7 = vadd.f32 %v462_v63, %v1217_v29 }
 0x67d   :  { %v457_v62 = vpop.f32.mrf.mxu0 }
 0x67e   :  { %1028 = vpow2.f32 %v931_v61  ;;  %v932_v18 = vmul.f32 -1.442695, %v466_v7 }
 0x67f   :  { %1030 = vtanh.f32 %v466_v7 }
 0x68b   :  { %v1029_v8 = vpop.eup %1028 }
 0x68c   :  { %v473_v9 = vadd.f32 1.0, %v1029_v8  ;;  %v1031_v13 = vpop.eup %1030 }
 0x68e   :  { %1032 = vrcp.f32 %v473_v9 }
 0x68f   :  { %1034 = vpow2.f32 %v932_v18 }
 0x69b   :  { %v1033_v15 = vpop.eup %1032 }
 0x69c   :  { %v484_v0 = vmul.f32 %v1033_v15, %v1031_v13  ;;  %v483_v16 = vmul.f32 %v1033_v15, %v481_v14  ;;  %v1035_v19 = vpop.eup %1034 }
 0x69d   :  { %v474_v20 = vadd.f32 1.0, %v1035_v19 }
 0x69e   :  { %486 = vrot.lane.b32.xlu0 %v484_v0, %s1090_s2 }
 0x69f   :  { %1036 = vrcp.f32 %v474_v20 }
 0x6ac   :  { %v1037_v29 = vpop.eup %1036 }
 0x710   :  { %v487_v21 = vpop.permute.xlu0 %486 }
 0x711   :  { %v489_v22 = vadd.f32 %v487_v21, %v483_v16 }
 0x713   :  { %1038 = vtanh.f32 %v489_v22  ;;  %v557_v48 = vrot.slane %v489_v22, 6 }
 0x720   :  { %v1039_v23 = vpop.eup %1038 }
 0x721   :  { %v491_v24 = vmul.f32 %v1039_v23, %v1037_v29 }
 0x723   :  { %v492_v25 = vpack.c.bf16 %v491_v24, %v491_v24 }
 0x725   :  { %v494_v26 = vrot.slane %v492_v25, 3 }
 0x727   :  { %495 = vrot.lane.b32.xlu1 %v494_v26, %s1090_s2 }
 0x799   :  { %v496_v28 = vpop.permute.xlu1 %495 }
 0x79a   :  { %933 = vmatmul.mubr.msk.bf16.vlgmr.msra.gmra.mxu1 %vm178_vm2, %v496_v28 }
 0x79b   :  { %666 = vmatpush1.bf16.msra.mxu1 %v1137_v3  ;;  %689 = vmatprep.mubr.bf16.mxu1 %v1089_v2 }
 0x79c   :  { %667 = vmatprep.subr.bf16.mxu1 %v1143_v4 }
 0x79f   :  { %668 = vmatpush1.bf16.msra.mxu1 %v1149_v5 }
 0x7a0   :  { %669 = vmatprep.subr.bf16.mxu1 %v1155_v6 }
 0x7a3   :  { %670 = vmatpush1.bf16.msra.mxu1 %v1167_v10 }
 0x7a4   :  { %671 = vmatprep.subr.bf16.mxu1 %v1173_v11 }
 0x7a7   :  { %672 = vmatpush1.bf16.msra.mxu1 %v1183_v12 }
 0x7a8   :  { %956 = vmatprep.subr.mxu1 %v1088_v1 }
 0x85a   :  { %v534_v31 = vpop.f32.mrf.mxu1 }
 0x85b   :  { %v541_v32 = vadd.f32 %v534_v31, %v1285_v30 }
 0x85c   :  { %v536_v33 = vpop.f32.mrf.mxu1 }
 0x85d   :  { %v934_v34 = vmul.f32 -1.442695, %v541_v32  ;;  %v542_v38 = vadd.f32 %v536_v33, %v1290_v37 }
 0x85e   :  { %v538_v35 = vpop.f32.mrf.mxu1 }
 0x85f   :  { %1040 = vpow2.f32 %v934_v34  ;;  %v935_v44 = vmul.f32 -1.442695, %v542_v38 }
 0x860   :  { %v539_v36 = vpop.f32.mrf.mxu1  ;;  %1042 = vtanh.f32 %v542_v38 }
 0x86c   :  { %v1041_v39 = vpop.eup %1040 }
 0x86d   :  { %v549_v40 = vadd.f32 1.0, %v1041_v39  ;;  %v1043_v17 = vpop.eup %1042 }
 0x86f   :  { %1044 = vrcp.f32 %v549_v40 }
 0x870   :  { %1046 = vpow2.f32 %v935_v44 }
 0x87c   :  { %v1045_v41 = vpop.eup %1044 }
 0x87d   :  { %v560_v42 = vmul.f32 %v1045_v41, %v1043_v17  ;;  %v559_v43 = vmul.f32 %v1045_v41, %v557_v48  ;;  %v1047_v45 = vpop.eup %1046 }
 0x87e   :  { %v550_v46 = vadd.f32 1.0, %v1047_v45 }
 0x87f   :  { %562 = vrot.lane.b32.xlu0 %v560_v42, %s1090_s2 }
 0x880   :  { %1048 = vrcp.f32 %v550_v46 }
 0x88d   :  { %v1049_v49 = vpop.eup %1048 }
 0x8f1   :  { %v563_v47 = vpop.permute.xlu0 %562 }
 0x8f2   :  { %v565_v27 = vadd.f32 %v563_v47, %v559_v43 }
 0x8f4   :  { %1050 = vtanh.f32 %v565_v27 }
 0x901   :  { %v1051_v50 = vpop.eup %1050 }
 0x902   :  { %v567_v51 = vmul.f32 %v1051_v50, %v1049_v49 }
 0x904   :  { %v568_v52 = vpack.c.bf16 %v567_v51, %v567_v51 }
 0x906   :  { %570 = vrot.lane.b32.xlu1 %v568_v52, %s1090_s2 }
 0x978   :  { %v571_v53 = vpop.permute.xlu1 %570 }
 0x979   :  { %936 = vmatmul.mubr.msk.bf16.vlgmr.msra.gmra.mxu0 %vm178_vm2, %v571_v53 }
 0x97a   :  { %748 = vmatpush1.bf16.msra.mxu0 %v1137_v3  ;;  %771 = vmatprep.mubr.bf16.mxu0 %v1089_v2 }
 0x97b   :  { %749 = vmatprep.subr.bf16.mxu0 %v1143_v4 }
 0x97e   :  { %750 = vmatpush1.bf16.msra.mxu0 %v1149_v5 }
 0x97f   :  { %751 = vmatprep.subr.bf16.mxu0 %v1155_v6 }
 0x982   :  { %752 = vmatpush1.bf16.msra.mxu0 %v1167_v10 }
 0x983   :  { %753 = vmatprep.subr.bf16.mxu0 %v1173_v11  ;;  %v638_v11 = vrot.slane %v565_v27, 6 }
 0x986   :  { %754 = vmatpush1.bf16.msra.mxu0 %v1183_v12 }
 0xa39   :  { %v609_v54 = vpop.f32.mrf.mxu0 }
 0xa3a   :  { %v618_v55 = vrot.slane %v609_v54, 6 }
 0xa3b   :  { %v611_v56 = vpop.f32.mrf.mxu0 }
 0xa3c   :  { %v622_v57 = vadd.f32 %v618_v55, %v1285_v30  ;;  %v619_v4 = vrot.slane %v611_v56, 6 }
 0xa3d   :  { %v613_v3 = vpop.f32.mrf.mxu0 }
 0xa3e   :  { %v937_v58 = vmul.f32 -1.442695, %v622_v57  ;;  %v623_v5 = vadd.f32 %v619_v4, %v1290_v37 }
 0xa3f   :  { %v614_v2 = vpop.f32.mrf.mxu0 }
 0xa40   :  { %1052 = vpow2.f32 %v937_v58  ;;  %v938_v62 = vmul.f32 -1.442695, %v623_v5 }
 0xa41   :  { %1054 = vtanh.f32 %v623_v5 }
 0xa4d   :  { %v1053_v59 = vpop.eup %1052 }
 0xa4e   :  { %v630_v6 = vadd.f32 1.0, %v1053_v59  ;;  %v1055_v10 = vpop.eup %1054  ;;  %v819_v59 = vld [vmem:[%s1361_s4 + $0x30] sm:$0xff] }
 0xa50   :  { %1056 = vrcp.f32 %v630_v6  ;;  %v817_v6 = vld [vmem:[%s1361_s4 + $0x20] sm:$0xff] }
 0xa51   :  { %1058 = vpow2.f32 %v938_v62 }
 0xa5d   :  { %v1057_v60 = vpop.eup %1056 }
 0xa5e   :  { %v641_v12 = vmul.f32 %v1057_v60, %v1055_v10  ;;  %v640_v61 = vmul.f32 %v1057_v60, %v638_v11  ;;  %v1059_v63 = vpop.eup %1058  ;;  %v816_v10 = vld [vmem:[%s1361_s4 + $0x18] sm:$0xff]  ;;  %v815_v11 = vld [vmem:[%s1361_s4 + $0x10] sm:$0xff]  ;;  %v814_v60 = vld [vmem:[%s1361_s4 + $0x8] sm:$0xff] }
 0xa5f   :  { %v631_v7 = vadd.f32 1.0, %v1059_v63 }
 0xa60   :  { %643 = vrot.lane.b32.xlu0 %v641_v12, %s1090_s2  ;;  %v813_v12 = vld [vmem:[%s1361_s4] sm:$0xff] }
 0xa61   :  { %1060 = vrcp.f32 %v631_v7 }
 0xa6e   :  { %v1061_v13 = vpop.eup %1060 }
 0xad2   :  { %v644_v8 = vpop.permute.xlu0 %643 }
 0xad3   :  { %v646_v9 = vadd.f32 %v644_v8, %v640_v61 }
 0xad5   :  { %1062 = vtanh.f32 %v646_v9  ;;  %v720_v33 = vrot.slane %v646_v9, 6 }
 0xae2   :  { %v1063_v14 = vpop.eup %1062 }
 0xae3   :  { %v648_v15 = vmul.f32 %v1063_v14, %v1061_v13 }
 0xae5   :  { %v649_v0 = vpack.c.bf16 %v648_v15, %v648_v15 }
 0xae7   :  { %v651_v16 = vrot.slane %v649_v0, 1 }
 0xae9   :  { %652 = vrot.lane.b32.xlu1 %v651_v16, %s1090_s2 }
 0xb5b   :  { %v653_v18 = vpop.permute.xlu1 %652 }
 0xb5c   :  { %939 = vmatmul.mubr.msk.bf16.vlgmr.msra.gmra.mxu1 %vm178_vm2, %v653_v18 }
 0xb5d   :  { %972 = vmatprep.mubr.msk.f32.mxu1 %vm1091_vm3, %v1088_v1 }
 0xc1c   :  { %v691_v19 = vpop.f32.mrf.mxu1 }
 0xc1d   :  { %v700_v20 = vrot.slane %v691_v19, 4 }
 0xc1e   :  { %v693_v21 = vpop.f32.mrf.mxu1 }
 0xc1f   :  { %v704_v22 = vadd.f32 %v700_v20, %v1285_v30  ;;  %v701_v25 = vrot.slane %v693_v21, 4 }
 0xc20   :  { %v695_v29 = vpop.f32.mrf.mxu1 }
 0xc21   :  { %v940_v23 = vmul.f32 -1.442695, %v704_v22  ;;  %v705_v26 = vadd.f32 %v701_v25, %v1290_v37 }
 0xc22   :  { %v696_v24 = vpop.f32.mrf.mxu1 }
 0xc23   :  { %1064 = vpow2.f32 %v940_v23  ;;  %v941_v38 = vmul.f32 -1.442695, %v705_v26 }
 0xc24   :  { %1066 = vtanh.f32 %v705_v26 }
 0xc30   :  { %v1065_v28 = vpop.eup %1064 }
 0xc31   :  { %v712_v31 = vadd.f32 1.0, %v1065_v28  ;;  %v1067_v32 = vpop.eup %1066 }
 0xc33   :  { %1068 = vrcp.f32 %v712_v31 }
 0xc34   :  { %1070 = vpow2.f32 %v941_v38 }
 0xc40   :  { %v1069_v34 = vpop.eup %1068 }
 0xc41   :  { %v723_v35 = vmul.f32 %v1069_v34, %v1067_v32  ;;  %v722_v36 = vmul.f32 %v1069_v34, %v720_v33  ;;  %v1071_v39 = vpop.eup %1070 }
 0xc42   :  { %v713_v40 = vadd.f32 1.0, %v1071_v39 }
 0xc43   :  { %725 = vrot.lane.b32.xlu0 %v723_v35, %s1090_s2 }
 0xc44   :  { %1072 = vrcp.f32 %v713_v40 }
 0xc51   :  { %v1073_v41 = vpop.eup %1072 }
 0xcb5   :  { %v726_v17 = vpop.permute.xlu0 %725 }
 0xcb6   :  { %v728_v48 = vadd.f32 %v726_v17, %v722_v36 }
 0xcb8   :  { %1074 = vtanh.f32 %v728_v48  ;;  %v802_v58 = vrot.slane %v728_v48, 6 }
 0xcc5   :  { %v1075_v42 = vpop.eup %1074 }
 0xcc6   :  { %v730_v43 = vmul.f32 %v1075_v42, %v1073_v41 }
 0xcc8   :  { %v731_v44 = vpack.c.bf16 %v730_v43, %v730_v43 }
 0xcca   :  { %v733_v45 = vrot.slane %v731_v44, 2 }
 0xccc   :  { %734 = vrot.lane.b32.xlu1 %v733_v45, %s1090_s2 }
 0xd3e   :  { %v735_v46 = vpop.permute.xlu1 %734 }
 0xd3f   :  { %942 = vmatmul.mubr.msk.bf16.vlgmr.msra.gmra.mxu0 %vm178_vm2, %v735_v46 }
 0xdff   :  { %v773_v47 = vpop.f32.mrf.mxu0 }
 0xe00   :  { %v782_v27 = vrot.slane %v773_v47, 2 }
 0xe01   :  { %v775_v49 = vpop.f32.mrf.mxu0 }
 0xe02   :  { %v786_v50 = vadd.f32 %v782_v27, %v1285_v30  ;;  %v783_v54 = vrot.slane %v775_v49, 2  ;;  %v820_v30 = vld [vmem:[%s1361_s4 + $0x38] sm:$0xff] }
 0xe03   :  { %v777_v51 = vpop.f32.mrf.mxu0  ;;  %957 = vmatpush3.msra.mxu1 %v820_v30 }
 0xe04   :  { %v943_v52 = vmul.f32 -1.442695, %v786_v50  ;;  %v787_v55 = vadd.f32 %v783_v54, %v1290_v37  ;;  %958 = vmatprep.subr.mxu1 %v1088_v1  ;;  %v818_v37 = vld [vmem:[%s1361_s4 + $0x28] sm:$0xff] }
 0xe05   :  { %v778_v53 = vpop.f32.mrf.mxu0  ;;  %959 = vmatpush3.msra.mxu1 %v819_v59 }
 0xe06   :  { %1076 = vpow2.f32 %v943_v52  ;;  %960 = vmatprep.subr.mxu1 %v1088_v1  ;;  %v944_v61 = vmul.f32 -1.442695, %v787_v55 }
 0xe07   :  { %1078 = vtanh.f32 %v787_v55  ;;  %961 = vmatpush3.msra.mxu1 %v818_v37 }
 0xe08   :  { %962 = vmatprep.subr.mxu1 %v1088_v1 }
 0xe09   :  { %963 = vmatpush3.msra.mxu1 %v817_v6 }
 0xe0a   :  { %964 = vmatprep.subr.mxu1 %v1088_v1 }
 0xe0b   :  { %965 = vmatpush3.msra.mxu1 %v816_v10 }
 0xe0c   :  { %966 = vmatprep.subr.mxu1 %v1088_v1 }
 0xe0d   :  { %967 = vmatpush3.msra.mxu1 %v815_v11 }
 0xe0e   :  { %968 = vmatprep.subr.mxu1 %v1088_v1 }
 0xe0f   :  { %969 = vmatpush3.msra.mxu1 %v814_v60 }
 0xe10   :  { %970 = vmatprep.subr.mxu1 %v1088_v1  ;;  %v945_v1 = vld [vmem:[%s1362_s5] ss:$0 sm:$0xff] }
 0xe11   :  { %971 = vmatpush3.msra.mxu1 %v813_v12 }
 0xe13   :  { %v1077_v56 = vpop.eup %1076 }
 0xe14   :  { %v794_v57 = vadd.f32 1.0, %v1077_v56  ;;  %v1079_v3 = vpop.eup %1078 }
 0xe16   :  { %1080 = vrcp.f32 %v794_v57 }
 0xe17   :  { %1082 = vpow2.f32 %v944_v61 }
 0xe23   :  { %v1081_v2 = vpop.eup %1080 }
 0xe24   :  { %v805_v4 = vmul.f32 %v1081_v2, %v1079_v3  ;;  %v804_v5 = vmul.f32 %v1081_v2, %v802_v58  ;;  %v1083_v62 = vpop.eup %1082 }
 0xe25   :  { %v795_v63 = vadd.f32 1.0, %v1083_v62 }
 0xe26   :  { %807 = vrot.lane.b32.xlu0 %v805_v4, %s1090_s2 }
 0xe27   :  { %1084 = vrcp.f32 %v795_v63 }
 0xe34   :  { %v1085_v9 = vpop.eup %1084 }
 0xe98   :  { %v808_v7 = vpop.permute.xlu0 %807 }
 0xe99   :  { %v810_v8 = vadd.f32 %v808_v7, %v804_v5 }
 0xe9b   :  { %1086 = vtanh.f32 %v810_v8 }
 0xea8   :  { %v1087_v13 = vpop.eup %1086 }
 0xea9   :  { %v812_v14 = vmul.f32 %v1087_v13, %v1085_v9 }
 0xeab   :  { %v829_v15 = vrot.slane %v812_v14, 6 }
 0xead   :  { %830 = vrot.lane.b32.xlu1 %v829_v15, %s1090_s2 }
 0xf1f   :  { %v831_v0 = vpop.permute.xlu1 %830 }
 0xf20   :  { %973 = vmatmul.mubr.msk.f32.vlgmr.msra.gmra.mxu1 %vm178_vm2, %v831_v0 }
 0xfe0   :  { %v900_v16 = vpop.f32.mrf.mxu1 }
 0xfe1   :  { %v901_v18 = vadd.f32 %v945_v1, %v900_v16 }
 0xfe2   :  { %v974_v19 = vpop.f32.mrf.mxu1 }
 0xfe3   :  { %905 = vst.msk [vmem:[%s1363_s6] sm:$0x3] %vm904_vm4, %v901_v18 }

</bundles_post_ra>
